<compile_context>
chip_gen: v7x
topology: tpu7x:2x2x1
jax: 0.10.0
libtpu: 0.0.40
codegen_flags: <defaults>
</compile_context>

<pallas_src>
import jax
import jax.numpy as jnp
from jax.experimental import pallas as pl
from jax.experimental.pallas import tpu as pltpu


def _round_up(a, b):
    return (a + b - 1) // b * b


def value_head_kernel(x_ref, wf_ref, bf_ref, ws_ref, wc_ref, shift_ref, bs_ref,
                      out_ref, h0_ref, acc_ref, oacc_ref):
    # x_ref   : (C, TM, HWp) f32   channel-major input slab for this batch tile
    # wf_ref  : (TK, TN)     bf16  full.weight^T tile
    # bf_ref  : (1, TN)      f32   full.bias tile
    # ws_ref  : (1, TN)      f32   shrink.weight tile
    # wc_ref  : (C,)         f32   SMEM: conv1x1 weight * folded BN scale
    # shift_ref, bs_ref: (1,) f32  SMEM: folded BN shift / shrink bias
    # out_ref : (TM, 1)      f32
    # h0_ref  : (TM, HWp)    bf16  scratch: cached conv+BN+ReLU activations
    # acc_ref : (TM, TN)     f32   scratch: full-Linear K accumulator
    # oacc_ref: (TM, 1)      f32   scratch: fused shrink accumulator over N
    n = pl.program_id(1)
    k = pl.program_id(2)
    nn = pl.num_programs(1)
    nk = pl.num_programs(2)

    C = x_ref.shape[0]
    TK = wf_ref.shape[0]
    koff = pl.multiple_of(k * TK, TK)

    # Stage A: conv1x1 (+ folded BN) + ReLU for this (m, k) tile.  Only on the
    # first N pass; cached in VMEM scratch for the remaining N tiles.
    @pl.when(n == 0)
    def _():
        y = x_ref[0, :, pl.ds(koff, TK)] * wc_ref[0]
        for c in range(1, C):                       # C is small & static
            y = y + x_ref[c, :, pl.ds(koff, TK)] * wc_ref[c]
        h0 = jnp.maximum(y + shift_ref[0], 0.0)
        h0_ref[:, pl.ds(koff, TK)] = h0.astype(h0_ref.dtype)

    # Stage B: full Linear, K accumulation on the MXU (bf16 in, f32 acc).
    @pl.when(k == 0)
    def _():
        acc_ref[...] = jnp.zeros_like(acc_ref)

    acc_ref[...] += jnp.dot(h0_ref[:, pl.ds(koff, TK)], wf_ref[...],
                            preferred_element_type=jnp.float32)

    # Stage C: on the last K tile, finish this N tile (bias + ReLU) and fuse
    # the shrink Linear as an elementwise multiply + lane reduction.
    @pl.when(k == nk - 1)
    def _():
        @pl.when(n == 0)
        def _():
            oacc_ref[...] = jnp.zeros_like(oacc_ref)

        h1 = jnp.maximum(acc_ref[...] + bf_ref[...], 0.0)       # (TM, TN) f32
        oacc_ref[...] += jnp.sum(h1 * ws_ref[...], axis=1, keepdims=True)

        @pl.when(n == nn - 1)
        def _():
            out_ref[...] = oacc_ref[...] + bs_ref[0]


def value_head_forward(x_nchw, params, *, eps=1e-5):
    """x_nchw: (B, C, H, W) float32 -> (B, 1) float32."""
    B, C, H, W = x_nchw.shape
    HW = H * W

    # ---- tile / padding plan ------------------------------------------------
    # Batch tile: pad to the 8-sublane granule, cap at 128 rows (fills v5e's
    # 128-wide MXU; fine on v6e/v7x and keeps the per-tile x slab small).
    Bp = _round_up(max(B, 8), 8)
    TM = min(Bp, 128)
    Bp = _round_up(Bp, TM)
    # N/K tiles of the full Linear: 512 keeps the double-buffered bf16 weight
    # tile at 1 MiB (fits v7x's 64 MiB VMEM) and is a multiple of both MXU
    # widths (128 on v5e, 256 on v6e/v7x).
    TKN = 512 if HW > 512 else _round_up(HW, 128)
    HWp = _round_up(HW, TKN)
    TN = TK = TKN

    # ---- operand prep: layout, BN fold, dtypes --------------------------------
    x = x_nchw.reshape(B, C, HW).astype(jnp.float32)
    x = jnp.transpose(x, (1, 0, 2))                         # (C, B, HW) channel-major
    x = jnp.pad(x, ((0, 0), (0, Bp - B), (0, HWp - HW)))    # zero-pad batch & HW

    inv_std = 1.0 / jnp.sqrt(params["bn_var"].astype(jnp.float32) + eps)
    scale = params["bn_gamma"].astype(jnp.float32) * inv_std
    shift = (params["bn_beta"].astype(jnp.float32)
             - params["bn_gamma"].astype(jnp.float32)
             * params["bn_mean"].astype(jnp.float32) * inv_std)
    # Fold the BN scale into the conv weight (touches only C scalars).
    wc = (params["conv_w"].reshape(C).astype(jnp.float32) * scale)
    shift = shift.reshape(1)

    # Zero padding of wf rows/cols, bf and ws guarantees padded HW positions
    # contribute nothing (so the garbage h0 values at padded pixels are inert).
    wf_t = jnp.pad(params["full_w"].T.astype(jnp.float32),
                   ((0, HWp - HW), (0, HWp - HW))).astype(jnp.bfloat16)
    bf = jnp.pad(params["full_b"].astype(jnp.float32).reshape(1, HW),
                 ((0, 0), (0, HWp - HW)))
    ws = jnp.pad(params["shrink_w"].astype(jnp.float32).reshape(1, HW),
                 ((0, 0), (0, HWp - HW)))
    bs = params["shrink_b"].astype(jnp.float32).reshape(1)

    grid = (Bp // TM, HWp // TN, HWp // TK)
    smem = pl.BlockSpec(memory_space=pltpu.MemorySpace.SMEM)

    out = pl.pallas_call(
        value_head_kernel,
        out_shape=jax.ShapeDtypeStruct((Bp, 1), jnp.float32),
        grid_spec=pltpu.PrefetchScalarGridSpec(
            num_scalar_prefetch=0,
            grid=grid,
            in_specs=[
                # x slab: block index depends only on m -> DMA'd once per batch tile.
                pl.BlockSpec((C, TM, HWp), lambda m, n, k: (0, m, 0)),
                pl.BlockSpec((TK, TN), lambda m, n, k: (k, n)),   # wf^T (bf16), streamed
                pl.BlockSpec((1, TN), lambda m, n, k: (0, n)),    # full.bias
                pl.BlockSpec((1, TN), lambda m, n, k: (0, n)),    # shrink.weight
                smem,                                             # conv weight * BN scale
                smem,                                             # BN shift
                smem,                                             # shrink bias
            ],
            out_specs=pl.BlockSpec((TM, 1), lambda m, n, k: (m, 0)),
            scratch_shapes=[
                pltpu.VMEM((TM, HWp), jnp.bfloat16),   # cached conv/BN/ReLU activations
                pltpu.VMEM((TM, TN), jnp.float32),     # full-Linear accumulator
                pltpu.VMEM((TM, 1), jnp.float32),      # fused shrink accumulator
            ],
        ),
        compiler_params=pltpu.CompilerParams(
            dimension_semantics=("parallel", "arbitrary", "arbitrary"),
            vmem_limit_bytes=48 * 1024 * 1024,
        ),
    )(x, wf_t, bf, ws, wc, shift, bs)

    return out[:B]


def _reference(x_nchw, params, *, eps=1e-5):
    """Pure-JAX f32 reference matching the PyTorch forward (BN in eval mode)."""
    B, C, H, W = x_nchw.shape
    internal = H * W
    y = jnp.einsum("bchw,oc->bohw", x_nchw, params["conv_w"].reshape(1, C))
    y = (y - params["bn_mean"]) / jnp.sqrt(params["bn_var"] + eps)
    y = y * params["bn_gamma"] + params["bn_beta"]
    y = jnp.maximum(y, 0.0)
    y = y.reshape(B, internal)
    y = jnp.maximum(y @ params["full_w"].T + params["full_b"], 0.0)
    return y @ params["shrink_w"].T + params["shrink_b"]


def make_params(key, c_in, internal):
    ks = jax.random.split(key, 6)
    return {
        # Conv2d(c_in, 1, kernel_size=1) weight; bias omitted (BN follows)
        "conv_w": jax.random.normal(ks[0], (1, c_in, 1, 1), jnp.float32) * 0.5,
        # BatchNorm2d(1), eval-mode running stats
        "bn_gamma": jnp.asarray(1.2, jnp.float32),
        "bn_beta": jnp.asarray(-0.1, jnp.float32),
        "bn_mean": jnp.asarray(0.05, jnp.float32),
        "bn_var": jnp.asarray(0.8, jnp.float32),
        # Linear(internal, internal)
        "full_w": jax.random.normal(ks[1], (internal, internal), jnp.float32)
                  * (1.0 / jnp.sqrt(internal)),
        "full_b": jax.random.normal(ks[2], (internal,), jnp.float32) * 0.01,
        # Linear(internal, 1)
        "shrink_w": jax.random.normal(ks[3], (1, internal), jnp.float32)
                    * (1.0 / jnp.sqrt(internal)),
        "shrink_b": jax.random.normal(ks[4], (1,), jnp.float32) * 0.01,
    }


if __name__ == "__main__":
    key = jax.random.PRNGKey(0)
    k_x, k_p = jax.random.split(key)

    B, C, H, W = 2, 4, 16, 16          # internal = H*W = 256
    x = jax.random.normal(k_x, (B, C, H, W), jnp.float32)
    params = make_params(k_p, C, H * W)

    out = value_head_forward(x, params)
    out = jax.block_until_ready(out)

    ref = _reference(x, params)
    assert out.shape == (B, 1), out.shape
    # bf16 weights/activations on the first matmul -> loose-ish tolerance.
    assert jnp.allclose(out, ref, atol=2e-2, rtol=2e-2), (out, ref)

    print("KERNEL_OK")
</pallas_src>

<mosaic_0001>
module attributes {stable_mosaic.version = 11 : i64} {
  func.func @value_head_kernel(%arg0: i32, %arg1: i32, %arg2: i32, %arg3: memref<4x8x256xf32, #tpu.memory_space<vmem>>, %arg4: memref<256x256xbf16, #tpu.memory_space<vmem>>, %arg5: memref<1x256xf32, #tpu.memory_space<vmem>>, %arg6: memref<1x256xf32, #tpu.memory_space<vmem>>, %arg7: memref<4xf32, #tpu.memory_space<smem>>, %arg8: memref<1xf32, #tpu.memory_space<smem>>, %arg9: memref<1xf32, #tpu.memory_space<smem>>, %arg10: memref<8x1xf32, #tpu.memory_space<vmem>>, %arg11: memref<8x256xbf16, #tpu.memory_space<vmem>>, %arg12: memref<8x256xf32, #tpu.memory_space<vmem>>, %arg13: memref<8x1xf32, #tpu.memory_space<vmem>>) attributes {dimension_semantics = [#tpu.dimension_semantics<parallel>, #tpu.dimension_semantics<arbitrary>, #tpu.dimension_semantics<arbitrary>], iteration_bounds = array<i64: 1, 1, 1>, scalar_prefetch = 0 : i64, scratch_operands = 3 : i64, tpu.core_type = #tpu.core_type<tc>, window_params = [{transform_indices = @transform_0, window_bounds = array<i64: 4, 8, 256>}, {transform_indices = @transform_1, window_bounds = array<i64: 256, 256>}, {transform_indices = @transform_2, window_bounds = array<i64: 1, 256>}, {transform_indices = @transform_3, window_bounds = array<i64: 1, 256>}, {transform_indices = @transform_4, window_bounds = array<i64: 4>}, {transform_indices = @transform_5, window_bounds = array<i64: 1>}, {transform_indices = @transform_6, window_bounds = array<i64: 1>}, {transform_indices = @transform_7, window_bounds = array<i64: 8, 1>}]} {
    %c256_i32 = arith.constant 256 : i32
    %0 = arith.muli %arg2, %c256_i32 : i32
    %1 = tpu.assume_multiple %0, 256 : i32
    %c0_i32 = arith.constant 0 : i32
    %2 = arith.cmpi eq, %arg1, %c0_i32 : i32
    %3 = arith.extui %2 : i1 to i32
    %c0_i32_0 = arith.constant 0 : i32
    %4 = arith.cmpi ne, %3, %c0_i32_0 : i32
    scf.if %4 {
      %c0_11 = arith.constant 0 : index
      %c0_12 = arith.constant 0 : index
      %18 = arith.index_cast %1 : i32 to index
      %19 = vector.load %arg3[%c0_11, %c0_12, %18] : memref<4x8x256xf32, #tpu.memory_space<vmem>>, vector<1x8x256xf32>
      %20 = vector.shape_cast %19 : vector<1x8x256xf32> to vector<8x256xf32>
      %c0_13 = arith.constant 0 : index
      %21 = memref.load %arg7[%c0_13] : memref<4xf32, #tpu.memory_space<smem>>
      %22 = vector.broadcast %21 : f32 to vector<8x256xf32>
      %23 = arith.mulf %20, %22 : vector<8x256xf32>
      %c1 = arith.constant 1 : index
      %c0_14 = arith.constant 0 : index
      %24 = arith.index_cast %1 : i32 to index
      %25 = vector.load %arg3[%c1, %c0_14, %24] : memref<4x8x256xf32, #tpu.memory_space<vmem>>, vector<1x8x256xf32>
      %26 = vector.shape_cast %25 : vector<1x8x256xf32> to vector<8x256xf32>
      %c1_15 = arith.constant 1 : index
      %27 = memref.load %arg7[%c1_15] : memref<4xf32, #tpu.memory_space<smem>>
      %28 = vector.broadcast %27 : f32 to vector<8x256xf32>
      %29 = arith.mulf %26, %28 : vector<8x256xf32>
      %30 = arith.addf %23, %29 : vector<8x256xf32>
      %c2 = arith.constant 2 : index
      %c0_16 = arith.constant 0 : index
      %31 = arith.index_cast %1 : i32 to index
      %32 = vector.load %arg3[%c2, %c0_16, %31] : memref<4x8x256xf32, #tpu.memory_space<vmem>>, vector<1x8x256xf32>
      %33 = vector.shape_cast %32 : vector<1x8x256xf32> to vector<8x256xf32>
      %c2_17 = arith.constant 2 : index
      %34 = memref.load %arg7[%c2_17] : memref<4xf32, #tpu.memory_space<smem>>
      %35 = vector.broadcast %34 : f32 to vector<8x256xf32>
      %36 = arith.mulf %33, %35 : vector<8x256xf32>
      %37 = arith.addf %30, %36 : vector<8x256xf32>
      %c3 = arith.constant 3 : index
      %c0_18 = arith.constant 0 : index
      %38 = arith.index_cast %1 : i32 to index
      %39 = vector.load %arg3[%c3, %c0_18, %38] : memref<4x8x256xf32, #tpu.memory_space<vmem>>, vector<1x8x256xf32>
      %40 = vector.shape_cast %39 : vector<1x8x256xf32> to vector<8x256xf32>
      %c3_19 = arith.constant 3 : index
      %41 = memref.load %arg7[%c3_19] : memref<4xf32, #tpu.memory_space<smem>>
      %42 = vector.broadcast %41 : f32 to vector<8x256xf32>
      %43 = arith.mulf %40, %42 : vector<8x256xf32>
      %44 = arith.addf %37, %43 : vector<8x256xf32>
      %c0_20 = arith.constant 0 : index
      %45 = memref.load %arg8[%c0_20] : memref<1xf32, #tpu.memory_space<smem>>
      %46 = vector.broadcast %45 : f32 to vector<8x256xf32>
      %47 = arith.addf %44, %46 : vector<8x256xf32>
      %cst_21 = arith.constant 0.000000e+00 : f32
      %48 = vector.broadcast %cst_21 : f32 to vector<8x256xf32>
      %49 = arith.maximumf %47, %48 : vector<8x256xf32>
      %50 = arith.truncf %49 : vector<8x256xf32> to vector<8x256xbf16>
      %c0_22 = arith.constant 0 : index
      %51 = arith.index_cast %1 : i32 to index
      %52 = vector.load %arg11[%c0_22, %51] : memref<8x256xbf16, #tpu.memory_space<vmem>>, vector<8x256xbf16>
      tpu.vector_store %arg11[%c0_22, %51], %50 {strides = array<i32>} : memref<8x256xbf16, #tpu.memory_space<vmem>>, vector<8x256xbf16>,
    } else {
    }
    %c0_i32_1 = arith.constant 0 : i32
    %5 = arith.cmpi eq, %arg2, %c0_i32_1 : i32
    %6 = arith.extui %5 : i1 to i32
    %c0_i32_2 = arith.constant 0 : i32
    %7 = arith.cmpi ne, %6, %c0_i32_2 : i32
    scf.if %7 {
      %cst_11 = arith.constant 0.000000e+00 : f32
      %18 = vector.broadcast %cst_11 : f32 to vector<8x256xf32>
      %c0_12 = arith.constant 0 : index
      %c0_13 = arith.constant 0 : index
      %19 = vector.load %arg12[%c0_12, %c0_13] : memref<8x256xf32, #tpu.memory_space<vmem>>, vector<8x256xf32>
      tpu.vector_store %arg12[%c0_12, %c0_13], %18 {strides = array<i32>} : memref<8x256xf32, #tpu.memory_space<vmem>>, vector<8x256xf32>,
    } else {
    }
    %c0 = arith.constant 0 : index
    %c0_3 = arith.constant 0 : index
    %8 = vector.load %arg12[%c0, %c0_3] : memref<8x256xf32, #tpu.memory_space<vmem>>, vector<8x256xf32>
    %c0_4 = arith.constant 0 : index
    %9 = arith.index_cast %1 : i32 to index
    %10 = vector.load %arg11[%c0_4, %9] : memref<8x256xbf16, #tpu.memory_space<vmem>>, vector<8x256xbf16>
    %c0_5 = arith.constant 0 : index
    %c0_6 = arith.constant 0 : index
    %11 = vector.load %arg4[%c0_5, %c0_6] : memref<256x256xbf16, #tpu.memory_space<vmem>>, vector<256x256xbf16>
    %cst = arith.constant dense<0.000000e+00> : vector<8x256xf32>
    %12 = tpu.matmul %10, %11, %cst {dimension_numbers = #tpu.dot_dimension_numbers<[1], [0], [0], [1], [0, 0, 1, 1], [], []>} : vector<8x256xbf16>, vector<256x256xbf16>, vector<8x256xf32> -> vector<8x256xf32>
    %13 = arith.addf %8, %12 : vector<8x256xf32>
    %c0_7 = arith.constant 0 : index
    %c0_8 = arith.constant 0 : index
    %14 = vector.load %arg12[%c0_7, %c0_8] : memref<8x256xf32, #tpu.memory_space<vmem>>, vector<8x256xf32>
    tpu.vector_store %arg12[%c0_7, %c0_8], %13 {strides = array<i32>} : memref<8x256xf32, #tpu.memory_space<vmem>>, vector<8x256xf32>,
    %c0_i32_9 = arith.constant 0 : i32
    %15 = arith.cmpi eq, %arg2, %c0_i32_9 : i32
    %16 = arith.extui %15 : i1 to i32
    %c0_i32_10 = arith.constant 0 : i32
    %17 = arith.cmpi ne, %16, %c0_i32_10 : i32
    scf.if %17 {
      %c0_i32_11 = arith.constant 0 : i32
      %18 = arith.cmpi eq, %arg1, %c0_i32_11 : i32
      %19 = arith.extui %18 : i1 to i32
      %c0_i32_12 = arith.constant 0 : i32
      %20 = arith.cmpi ne, %19, %c0_i32_12 : i32
      scf.if %20 {
        %cst_27 = arith.constant 0.000000e+00 : f32
        %38 = vector.broadcast %cst_27 : f32 to vector<8x1xf32>
        %c0_28 = arith.constant 0 : index
        %c0_29 = arith.constant 0 : index
        %39 = vector.load %arg13[%c0_28, %c0_29] : memref<8x1xf32, #tpu.memory_space<vmem>>, vector<8x1xf32>
        tpu.vector_store %arg13[%c0_28, %c0_29], %38 {strides = array<i32>} : memref<8x1xf32, #tpu.memory_space<vmem>>, vector<8x1xf32>,
      } else {
      }
      %c0_13 = arith.constant 0 : index
      %c0_14 = arith.constant 0 : index
      %21 = vector.load %arg12[%c0_13, %c0_14] : memref<8x256xf32, #tpu.memory_space<vmem>>, vector<8x256xf32>
      %c0_15 = arith.constant 0 : index
      %c0_16 = arith.constant 0 : index
      %22 = vector.load %arg5[%c0_15, %c0_16] : memref<1x256xf32, #tpu.memory_space<vmem>>, vector<1x256xf32>
      %23 = vector.broadcast %22 : vector<1x256xf32> to vector<8x256xf32>
      %24 = arith.addf %21, %23 : vector<8x256xf32>
      %cst_17 = arith.constant 0.000000e+00 : f32
      %25 = vector.broadcast %cst_17 : f32 to vector<8x256xf32>
      %26 = arith.maximumf %24, %25 : vector<8x256xf32>
      %c0_18 = arith.constant 0 : index
      %c0_19 = arith.constant 0 : index
      %27 = vector.load %arg13[%c0_18, %c0_19] : memref<8x1xf32, #tpu.memory_space<vmem>>, vector<8x1xf32>
      %c0_20 = arith.constant 0 : index
      %c0_21 = arith.constant 0 : index
      %28 = vector.load %arg6[%c0_20, %c0_21] : memref<1x256xf32, #tpu.memory_space<vmem>>, vector<1x256xf32>
      %29 = vector.broadcast %28 : vector<1x256xf32> to vector<8x256xf32>
      %30 = arith.mulf %26, %29 : vector<8x256xf32>
      %cst_22 = arith.constant dense<0.000000e+00> : vector<8xf32>
      %31 = vector.multi_reduction <add>, %30, %cst_22 [1] : vector<8x256xf32> to vector<8xf32>
      %32 = vector.shape_cast %31 : vector<8xf32> to vector<8x1xf32>
      %33 = arith.addf %27, %32 : vector<8x1xf32>
      %c0_23 = arith.constant 0 : index
      %c0_24 = arith.constant 0 : index
      %34 = vector.load %arg13[%c0_23, %c0_24] : memref<8x1xf32, #tpu.memory_space<vmem>>, vector<8x1xf32>
      tpu.vector_store %arg13[%c0_23, %c0_24], %33 {strides = array<i32>} : memref<8x1xf32, #tpu.memory_space<vmem>>, vector<8x1xf32>,
      %c0_i32_25 = arith.constant 0 : i32
      %35 = arith.cmpi eq, %arg1, %c0_i32_25 : i32
      %36 = arith.extui %35 : i1 to i32
      %c0_i32_26 = arith.constant 0 : i32
      %37 = arith.cmpi ne, %36, %c0_i32_26 : i32
      scf.if %37 {
        %c0_27 = arith.constant 0 : index
        %c0_28 = arith.constant 0 : index
        %38 = vector.load %arg13[%c0_27, %c0_28] : memref<8x1xf32, #tpu.memory_space<vmem>>, vector<8x1xf32>
        %c0_29 = arith.constant 0 : index
        %39 = memref.load %arg9[%c0_29] : memref<1xf32, #tpu.memory_space<smem>>
        %40 = vector.broadcast %39 : f32 to vector<8x1xf32>
        %41 = arith.addf %38, %40 : vector<8x1xf32>
        %c0_30 = arith.constant 0 : index
        %c0_31 = arith.constant 0 : index
        %42 = vector.load %arg10[%c0_30, %c0_31] : memref<8x1xf32, #tpu.memory_space<vmem>>, vector<8x1xf32>
        tpu.vector_store %arg10[%c0_30, %c0_31], %41 {strides = array<i32>} : memref<8x1xf32, #tpu.memory_space<vmem>>, vector<8x1xf32>,
      } else {
      }
    } else {
    }
    return
  }
  func.func @transform_0(%arg0: i32, %arg1: i32, %arg2: i32) -> (i32, i32, i32) {
    %c0_i32 = arith.constant 0 : i32
    %c0_i32_0 = arith.constant 0 : i32
    %c0_i32_1 = arith.constant 0 : i32
    return %c0_i32, %arg0, %c0_i32_0 : i32, i32, i32
  }
  func.func @transform_1(%arg0: i32, %arg1: i32, %arg2: i32) -> (i32, i32) {
    %c0_i32 = arith.constant 0 : i32
    return %arg2, %arg1 : i32, i32
  }
  func.func @transform_2(%arg0: i32, %arg1: i32, %arg2: i32) -> (i32, i32) {
    %c0_i32 = arith.constant 0 : i32
    %c0_i32_0 = arith.constant 0 : i32
    return %c0_i32, %arg1 : i32, i32
  }
  func.func @transform_3(%arg0: i32, %arg1: i32, %arg2: i32) -> (i32, i32) {
    %c0_i32 = arith.constant 0 : i32
    %c0_i32_0 = arith.constant 0 : i32
    return %c0_i32, %arg1 : i32, i32
  }
  func.func @transform_4(%arg0: i32, %arg1: i32, %arg2: i32) -> i32 {
    %c0_i32 = arith.constant 0 : i32
    %c0_i32_0 = arith.constant 0 : i32
    return %c0_i32 : i32
  }
  func.func @transform_5(%arg0: i32, %arg1: i32, %arg2: i32) -> i32 {
    %c0_i32 = arith.constant 0 : i32
    %c0_i32_0 = arith.constant 0 : i32
    return %c0_i32 : i32
  }
  func.func @transform_6(%arg0: i32, %arg1: i32, %arg2: i32) -> i32 {
    %c0_i32 = arith.constant 0 : i32
    %c0_i32_0 = arith.constant 0 : i32
    return %c0_i32 : i32
  }
  func.func @transform_7(%arg0: i32, %arg1: i32, %arg2: i32) -> (i32, i32) {
    %c0_i32 = arith.constant 0 : i32
    %c0_i32_0 = arith.constant 0 : i32
    return %arg0, %c0_i32 : i32, i32
  }
}

</mosaic_0001>

<bundles_post_ra>
// kernel: tpu_custom_call.1
= control target key start
LH: loop header
LB: loop body
LE: loop exit
PB: predicated region body
PF: predicated region fallthrough
CT: control target
= control target key end

     0   :  { %14 = vsyncpa [#allocation8], 0  ;;  %s732_s0 = inlined_call_operand.hbm [shape: f32[4,8,256], index: 0, kind: input, shape index: {}]   ;;  %s733_s1 = inlined_call_operand.hbm [shape: bf16[256,256], index: 1, kind: input, shape index: {}]   ;;  %s734_s2 = inlined_call_operand.vmem [shape: f32[1,256], index: 2, kind: input, shape index: {}]   ;;  %s735_s3 = inlined_call_operand.vmem [shape: f32[1,256], index: 3, kind: input, shape index: {}]   ;;  %s736_s4 = inlined_call_operand.vmem [shape: f32[4], index: 4, kind: input, shape index: {}]   ;;  %s737_s5 = inlined_call_operand.<no memory space> [shape: f32[1], index: 5, kind: input, shape index: {}]   ;;  %s738_s6 = inlined_call_operand.<no memory space> [shape: f32[1], index: 6, kind: input, shape index: {}]   ;;  %s739_s7 = inlined_call_operand.vmem [shape: f32[8,1], index: 7, kind: output, shape index: {}]  }
   0x1   :  { %15 = vsyncpa [#allocation11], 0 }
   0x2   :  { %16 = vsyncpa [#allocation9], 0  ;;  %s627_s24 = smov [#allocation7]   ;;  %s565_s28 = scalar_lea.hbm %s732_s0, 1024 }
   0x3   :  { %s22_s25 = sshll.u32 %s627_s24, 4  ;;  %p566_p0 = scmp.ne.s32.totalorder %s732_s0, %s565_s28  ;;  %s23_s25 = int_to_ptr.vmem [resolvable:$true] %s22_s25 }
   0x4   :  { %p569_p1 = scmp.lt.u32.totalorder %s565_s28, %s732_s0 }
   0x6   :  { %p571_p2 = pnand %p569_p1, %p566_p0 }
   0x8   :  { %574 = shalt.err (!%p571_p2)
}
   0x9   :  { %s575_s10 = scalar_lea.vmem %s23_s25, 1024  ;;  %p580_p4 = scmp.lt.s32.totalorder %s23_s25, %s23_s25 }
   0xa   :  { %p576_p3 = scmp.ne.s32.totalorder %s23_s25, %s575_s10  ;;  %p581_p5 = scmp.lt.s32.totalorder %s575_s10, %s575_s10 }
   0xc   :  { %p582_p6 = por %p581_p5, %p580_p4 }
   0xe   :  { %p583_p7 = pnand %p582_p6, %p576_p3 }
  0x10   :  { %586 = shalt.err (!%p583_p7)
}
  0x11   :  { %s628_s11 = smov 256   ;;  %s629_s12 = smov 16  }
  0x12   :  { %28 = dma.hbm_to_vmem [thread:$0]  %s732_s0, 1024, %s23_s25, [#allocation8], %s628_s11, %s628_s11, %s629_s12  }
  0x13   :  { %s630_s15 = smov [#allocation10]   ;;  %s587_s19 = scalar_lea.hbm %s733_s1, 4096 }
  0x14   :  { %s34_s16 = sshll.u32 %s630_s15, 4  ;;  %p588_p8 = scmp.ne.s32.totalorder %s733_s1, %s587_s19  ;;  %s35_s16 = int_to_ptr.vmem [resolvable:$true] %s34_s16 }
  0x15   :  { %p591_p9 = scmp.lt.u32.totalorder %s587_s19, %s733_s1 }
  0x17   :  { %p593_p10 = pnand %p591_p9, %p588_p8 }
  0x19   :  { %596 = shalt.err (!%p593_p10)
}
  0x1a   :  { %s597_s24 = scalar_lea.vmem %s35_s16, 4096  ;;  %p602_p12 = scmp.lt.s32.totalorder %s35_s16, %s35_s16 }
  0x1b   :  { %p598_p11 = scmp.ne.s32.totalorder %s35_s16, %s597_s24  ;;  %p603_p13 = scmp.lt.s32.totalorder %s597_s24, %s597_s24 }
  0x1d   :  { %p604_p0 = por %p603_p13, %p602_p12 }
  0x1f   :  { %p605_p1 = pnand %p604_p0, %p598_p11 }
  0x21   :  { %608 = shalt.err (!%p605_p1)
}
  0x22   :  { %s631_s0 = smov 128   ;;  %s632_s25 = smov 8  }
  0x23   :  { %40 = dma.hbm_to_vmem [thread:$0]  %s733_s1, 4096, %s35_s16, [#allocation11], %s631_s0, %s631_s0, %s632_s25  }
  0x24   :  { %s51_s30 = sshll.u32 %s736_s4, 4  ;;  %s52_s30 = int_to_ptr.vmem [resolvable:$true] %s51_s30 }
  0x25   :  { %s609_s8 = scalar_lea.vmem %s52_s30, 16  ;;  %p614_p3 = scmp.lt.s32.totalorder %s52_s30, %s52_s30 }
  0x26   :  { %p610_p2 = scmp.ne.s32.totalorder %s52_s30, %s609_s8  ;;  %p615_p4 = scmp.lt.s32.totalorder %s609_s8, %s609_s8 }
  0x28   :  { %p616_p5 = por %p615_p4, %p614_p3 }
  0x2a   :  { %p617_p6 = pnand %p616_p5, %p610_p2 }
  0x2c   :  { %620 = shalt.err (!%p617_p6)
}
  0x2d   :  { %s633_s9 = smov [#allocation12]  }
  0x2e   :  { %54 = dma.vmem_to_smem %s52_s30, 16, %s633_s9, [#allocation9]  }
  0x2f   :  { %621 = dma.done.wait [#allocation8], 1024  }
  0x30   :  { %622 = vsyncadd [#allocation8], 4294966272 }
  0x31   :  { %623 = dma.done.wait [#allocation11], 4096  }
  0x32   :  { %624 = vsyncadd [#allocation11], 4294963200 }
  0x33   :  { %625 = dma.done.wait [#allocation9], 16  }
  0x34   :  { %626 = vsyncadd [#allocation9], 4294967280 }
  0x35   :  { %68 = sfence }
  0x36   :  { %v517_v0 = vld [vmem:[#allocation10 + $0x4] ss:$8 sps:$4 sm:$0xff]   ;;  %v519_v1 = vld [vmem:[#allocation10] ss:$8 sps:$4 sm:$0xff]   ;;  %v520_v2 = vld [vmem:[#allocation10 + $0x14] ss:$8 sps:$4 sm:$0xff]   ;;  %v118_v31 = vstv %s737_s5 }
  0x37   :  { %346 = vmatprep.subr.bf16.mxu0 %v517_v0  ;;  %v522_v3 = vld [vmem:[#allocation10 + $0x10] ss:$8 sps:$4 sm:$0xff]   ;;  %v523_v4 = vld [vmem:[#allocation10 + $0x24] ss:$8 sps:$4 sm:$0xff]   ;;  %v525_v5 = vld [vmem:[#allocation10 + $0x20] ss:$8 sps:$4 sm:$0xff]  }
  0x38   :  { %347 = vmatpush1.bf16.msra.mxu0 %v519_v1  ;;  %v526_v6 = vld [vmem:[#allocation10 + $0x34] ss:$8 sps:$4 sm:$0xff]   ;;  %v528_v7 = vld [vmem:[#allocation10 + $0x30] ss:$8 sps:$4 sm:$0xff]   ;;  %s702_s1 = sld [smem:[#allocation12]]  ;;  %s704_s4 = sld [smem:[#allocation12 + $0x1]] }
  0x39   :  { %348 = vmatprep.subr.bf16.mxu0 %v520_v2  ;;  %v529_v8 = vld [vmem:[#allocation10 + $0x44] ss:$8 sps:$4 sm:$0xff]   ;;  %s706_s10 = sld [smem:[#allocation12 + $0x2]]  ;;  %s708_s11 = sld [smem:[#allocation12 + $0x3]]  ;;  %v531_v9 = vld [vmem:[#allocation10 + $0x40] ss:$8 sps:$4 sm:$0xff]   ;;  %v403_v2 = vlaneseq }
  0x3a   :  { %v532_v10 = vld [vmem:[#allocation10 + $0x54] ss:$8 sps:$4 sm:$0xff]   ;;  %v534_v11 = vld [vmem:[#allocation10 + $0x50] ss:$8 sps:$4 sm:$0xff]   ;;  %v535_v13 = vld [vmem:[#allocation10 + $0x64] ss:$8 sps:$4 sm:$0xff]  }
  0x3b   :  { %v79_v15 = vld [vmem:[#allocation7 + $0x8] sm:$0xff]  ;;  %v88_v18 = vld [vmem:[#allocation7 + $0x18] sm:$0xff]  ;;  %v78_v38 = vld [vmem:[#allocation7] sm:$0xff]  ;;  %vm397_vm0 = vcmask 7168   ;;  %v634_v1 = vmov 0.0  }
  0x3c   :  { %349 = vmatpush1.bf16.msra.mxu0 %v522_v3  ;;  %v537_v20 = vld [vmem:[#allocation10 + $0x60] ss:$8 sps:$4 sm:$0xff]   ;;  %v110_v23 = vld [vmem:[#allocation7 + $0x38] sm:$0xff]  ;;  %v541_v30 = vld [vmem:[#allocation10 + $0x84] ss:$8 sps:$4 sm:$0xff]   ;;  %398 = vst.msk [vmem:[#allocation4] sm:$0xff] %vm397_vm0, %v634_v1 }
  0x3d   :  { %350 = vmatprep.subr.bf16.mxu0 %v523_v4  ;;  %v99_v22 = vld [vmem:[#allocation7 + $0x28] sm:$0xff]  ;;  %v538_v24 = vld [vmem:[#allocation10 + $0x74] ss:$8 sps:$4 sm:$0xff]   ;;  %v540_v28 = vld [vmem:[#allocation10 + $0x70] ss:$8 sps:$4 sm:$0xff]   ;;  %v404_v3 = vshrl.u32 %v403_v2, 7 }
  0x3e   :  { %v81_v12 = vstv %s702_s1  ;;  %v90_v14 = vstv %s704_s4  ;;  %v543_v33 = vld [vmem:[#allocation10 + $0x80] ss:$8 sps:$4 sm:$0xff]   ;;  %v544_v35 = vld [vmem:[#allocation10 + $0x94] ss:$8 sps:$4 sm:$0xff]   ;;  %v546_v37 = vld [vmem:[#allocation10 + $0x90] ss:$8 sps:$4 sm:$0xff]  }
  0x3f   :  { %v101_v16 = vstv %s706_s10  ;;  %v83_v17 = vmul.f32 %v81_v12, %v79_v15  ;;  %v112_v19 = vstv %s708_s11  ;;  %v92_v21 = vmul.f32 %v90_v14, %v88_v18  ;;  %v87_v39 = vld [vmem:[#allocation7 + $0x10] sm:$0xff]  ;;  %v547_v41 = vld [vmem:[#allocation10 + $0xa4] ss:$8 sps:$4 sm:$0xff]   ;;  %v549_v44 = vld [vmem:[#allocation10 + $0xa0] ss:$8 sps:$4 sm:$0xff]  }
  0x40   :  { %351 = vmatpush1.bf16.msra.mxu0 %v525_v5  ;;  %v103_v25 = vmul.f32 %v101_v16, %v99_v22  ;;  %v114_v27 = vmul.f32 %v112_v19, %v110_v23  ;;  %v82_v42 = vmul.f32 %v81_v12, %v78_v38  ;;  %v91_v43 = vmul.f32 %v90_v14, %v87_v39  ;;  %v98_v45 = vld [vmem:[#allocation7 + $0x20] sm:$0xff]  ;;  %v550_v46 = vld [vmem:[#allocation10 + $0xb4] ss:$8 sps:$4 sm:$0xff]   ;;  %v552_v49 = vld [vmem:[#allocation10 + $0xb0] ss:$8 sps:$4 sm:$0xff]  }
  0x41   :  { %352 = vmatprep.subr.bf16.mxu0 %v526_v6  ;;  %v94_v26 = vadd.f32 %v92_v21, %v83_v17  ;;  %v102_v48 = vmul.f32 %v101_v16, %v98_v45  ;;  %v109_v50 = vld [vmem:[#allocation7 + $0x30] sm:$0xff]  ;;  %v553_v51 = vld [vmem:[#allocation10 + $0xc4] ss:$8 sps:$4 sm:$0xff]   ;;  %v555_v54 = vld [vmem:[#allocation10 + $0xc0] ss:$8 sps:$4 sm:$0xff]   ;;  %v405_v4 = vsub.s32 0, %v404_v3 }
  0x42   :  { %v93_v47 = vadd.f32 %v91_v43, %v82_v42  ;;  %v113_v53 = vmul.f32 %v112_v19, %v109_v50  ;;  %v556_v55 = vld [vmem:[#allocation10 + $0xd4] ss:$8 sps:$4 sm:$0xff]   ;;  %v558_v57 = vld [vmem:[#allocation10 + $0xd0] ss:$8 sps:$4 sm:$0xff]   ;;  %v559_v58 = vld [vmem:[#allocation10 + $0xe4] ss:$8 sps:$4 sm:$0xff]  }
  0x43   :  { %v105_v29 = vadd.f32 %v103_v25, %v94_v26  ;;  %v561_v60 = vld [vmem:[#allocation10 + $0xe0] ss:$8 sps:$4 sm:$0xff]   ;;  %v562_v61 = vld [vmem:[#allocation10 + $0xf4] ss:$8 sps:$4 sm:$0xff]   ;;  %v564_v63 = vld [vmem:[#allocation10 + $0xf0] ss:$8 sps:$4 sm:$0xff]   ;;  %v443_v26 = vstv %s738_s6 }
  0x44   :  { %353 = vmatpush1.bf16.msra.mxu0 %v528_v7  ;;  %v104_v52 = vadd.f32 %v102_v48, %v93_v47  ;;  %v401_v5 = vld [vmem:[%s734_s2] sm:$0x3]  ;;  %v409_v6 = vsub.s32 1, %v404_v3 }
  0x45   :  { %354 = vmatprep.subr.bf16.mxu0 %v529_v8  ;;  %v116_v32 = vadd.f32 %v114_v27, %v105_v29  ;;  %v406_v7 = vrot.slane %v401_v5, %v405_v4  ;;  %v417_v23 = vld [vmem:[#allocation4] sm:$0xff] }
  0x46   :  { %v115_v56 = vadd.f32 %v113_v53, %v104_v52  ;;  %v410_v8 = vrot.slane %v401_v5, %v409_v6 }
  0x47   :  { %v120_v34 = vadd.f32 %v118_v31, %v116_v32 }
  0x48   :  { %355 = vmatpush1.bf16.msra.mxu0 %v531_v9  ;;  %v119_v59 = vadd.f32 %v118_v31, %v115_v56  ;;  %v418_v9 = vld [vmem:[%s735_s3] sm:$0x3] }
  0x49   :  { %356 = vmatprep.subr.bf16.mxu0 %v532_v10  ;;  %v122_v36 = vmax.f32 %v120_v34, 0.0  ;;  %v427_v16 = vrot.slane %v418_v9, %v409_v6 }
  0x4a   :  { %v121_v62 = vmax.f32 %v119_v59, 0.0 }
  0x4b   :  { %v508_v40 = vpack.c.bf16 %v122_v36, %v122_v36 }
  0x4c   :  { %357 = vmatpush1.bf16.msra.mxu0 %v534_v11  ;;  %v507_v0 = vpack.c.bf16 %v121_v62, %v121_v62 }
  0x4d   :  { %358 = vmatprep.subr.bf16.mxu0 %v535_v13  ;;  %378 = vmatprep.mubr.bf16.mxu0 %v508_v40  ;;  %v423_v13 = vrot.slane %v418_v9, %v405_v4 }
  0x50   :  { %359 = vmatpush1.bf16.msra.mxu0 %v537_v20 }
  0x51   :  { %360 = vmatprep.subr.bf16.mxu0 %v538_v24 }
  0x54   :  { %361 = vmatpush1.bf16.msra.mxu0 %v540_v28 }
  0x55   :  { %362 = vmatprep.subr.bf16.mxu0 %v541_v30 }
  0x58   :  { %363 = vmatpush1.bf16.msra.mxu0 %v543_v33 }
  0x59   :  { %364 = vmatprep.subr.bf16.mxu0 %v544_v35 }
  0x5c   :  { %365 = vmatpush1.bf16.msra.mxu0 %v546_v37 }
  0x5d   :  { %366 = vmatprep.subr.bf16.mxu0 %v547_v41 }
  0x60   :  { %367 = vmatpush1.bf16.msra.mxu0 %v549_v44 }
  0x61   :  { %368 = vmatprep.subr.bf16.mxu0 %v550_v46 }
  0x64   :  { %369 = vmatpush1.bf16.msra.mxu0 %v552_v49 }
  0x65   :  { %370 = vmatprep.subr.bf16.mxu0 %v553_v51 }
  0x68   :  { %371 = vmatpush1.bf16.msra.mxu0 %v555_v54 }
  0x69   :  { %372 = vmatprep.subr.bf16.mxu0 %v556_v55 }
  0x6c   :  { %373 = vmatpush1.bf16.msra.mxu0 %v558_v57 }
  0x6d   :  { %374 = vmatprep.subr.bf16.mxu0 %v559_v58 }
  0x70   :  { %375 = vmatpush1.bf16.msra.mxu0 %v561_v60 }
  0x71   :  { %376 = vmatprep.subr.bf16.mxu0 %v562_v61 }
  0x74   :  { %377 = vmatpush1.bf16.msra.mxu0 %v564_v63 }
  0x77   :  { %379 = vmatmul.mubr.bf16.vlgmr.msra.gmra.mrb[0].mxu0 %v507_v0 }
 0x14a   :  { %v380_v10 = vpop.f32.mrb[0].mxu0 }
 0x14b   :  { %v413_v11 = vadd.f32 %v406_v7, %v380_v10  ;;  %v382_v12 = vpop.f32.mrb[1].mxu0 }
 0x14c   :  { %v414_v14 = vadd.f32 %v410_v8, %v382_v12  ;;  %v384_v15 = vpop.f32.mrb[2].mxu0 }
 0x14d   :  { %v415_v17 = vmax.f32 %v413_v11, 0.0  ;;  %v385_v18 = vpop.f32.mrb[3].mxu0 }
 0x14e   :  { %v416_v19 = vmax.f32 %v414_v14, 0.0 }
 0x14f   :  { %v430_v20 = vmul.f32 %v423_v13, %v415_v17 }
 0x150   :  { %v431_v21 = vmul.f32 %v427_v16, %v416_v19 }
 0x152   :  { %v432_v22 = vadd.f32 %v431_v21, %v430_v20 }
 0x154   :  { %433 = vadd.xlane.f32.xlu0 %v432_v22 }
 0x1e1   :  { %v434_v24 = vpop.xlane.xlu0 %433 }
 0x1e2   :  { %v435_v25 = vadd.f32 %v434_v24, %v417_v23 }
 0x1e4   :  { %437 = vst.msk [vmem:[#allocation4] sm:$0xff] %vm397_vm0, %v435_v25 }
 0x1eb   :  { %v441_v27 = vld [vmem:[#allocation4] sm:$0xff] }
 0x1ec   :  { %v444_v28 = vadd.f32 %v443_v26, %v441_v27 }
 0x1ee   :  { %445 = vst.msk [vmem:[%s739_s7] sm:$0xff] %vm397_vm0, %v444_v28 }
 0x1ef   :  { %450 = vsyncpa [#allocation8], 1 }
 0x1f0   :  { %451 = vsyncpa [#allocation11], 1 }
 0x1f1   :  { %452 = vsyncpa [#allocation9], 1 }

</bundles_post_ra>
